<compile_context>
chip_gen: v7x
topology: tpu7x:2x2x1
jax: 0.10.0
libtpu: 0.0.40
codegen_flags: <defaults>
</compile_context>

<pallas_src>
import functools

import jax
import jax.numpy as jnp
from jax.experimental import pallas as pl
from jax.experimental.pallas import tpu as pltpu


# ----------------------------- helpers -------------------------------------


def _round_up(x: int, m: int) -> int:
    return (x + m - 1) // m * m


def _pad_to(a, shape):
    pads = [(0, s - d) for d, s in zip(a.shape, shape)]
    return jnp.pad(a, pads)


# ----------------------------- fused kernel --------------------------------


def _mlp_fused_kernel(
    x_ref,      # (TM, Dp)   bf16
    w_in_ref,   # (Dp, Kp)   bf16
    b_in_ref,   # (1, Kp)    f32
    w_hid_ref,  # (Lh, Kp, Kp) bf16
    b_hid_ref,  # (Lh, 1, Kp)  f32
    w_out_ref,  # (Kp, Op)   bf16
    b_out_ref,  # (1, Op)    f32
    o_ref,      # (TM, Op)   f32
    *,
    n_hidden: int,
):
    # First layer: Linear(D,K) + ReLU (the duplicated ReLU in the Sequential is a no-op).
    acc = jnp.dot(x_ref[...], w_in_ref[...], preferred_element_type=jnp.float32)
    h = jnp.maximum(acc + b_in_ref[...], 0.0)  # f32 (TM, Kp)

    # Hidden blocks: each is (ReLU, Linear(K,K)).  Static unrolled loop; weights are
    # read layer-by-layer from the VMEM-resident stacked array.
    for i in range(n_hidden):
        h_bf = jnp.maximum(h, 0.0).astype(jnp.bfloat16)
        acc = jnp.dot(h_bf, w_hid_ref[i], preferred_element_type=jnp.float32)
        h = acc + b_hid_ref[i]  # f32; NOT relu'd here (next block's ReLU handles it)

    # Final Linear(K,O): no preceding activation.
    out = jnp.dot(h.astype(jnp.bfloat16), w_out_ref[...],
                  preferred_element_type=jnp.float32)
    out = out + b_out_ref[...]
    o_ref[...] = out.astype(o_ref.dtype)


def _vmem_limit_bytes(tm, dp, kp, op, lh):
    w_bytes = 2 * (dp * kp + lh * kp * kp + kp * op)        # bf16 weights
    b_bytes = 4 * (kp + lh * kp + op)                       # f32 biases
    io_bytes = 2 * (2 * tm * dp) + 2 * (4 * tm * op)        # double-buffered x / out tiles
    act_bytes = 2 * 4 * tm * kp                             # f32 activation working set
    est = 2 * (w_bytes + b_bytes) + io_bytes + act_bytes + (2 << 20)
    return int(min(max(est, 16 << 20), 64 << 20))           # 64 MiB cap (v7x-safe)


def mlp_forward(params, x, L):
    """Fused MLP forward: Linear(D,K) -> ReLU -> [ReLU -> Linear(K,K)]*L -> Linear(K,O)."""
    N, D = x.shape
    K = params["w_in"].shape[1]
    O = params["w_out"].shape[1]

    # Padded (lane-dense / MXU-friendly) sizes.
    Dp = _round_up(D, 128)
    Kp = _round_up(K, 128)
    Op = _round_up(O, 128)
    TM = min(256, _round_up(N, 8))
    Np = _round_up(N, TM)
    Lh = max(L, 1)  # keep a (1, Kp, Kp) dummy when L == 0 so shapes stay static

    # Pad + cast weights (bf16) and biases (f32).
    x_p = _pad_to(x, (Np, Dp)).astype(jnp.bfloat16)
    w_in = _pad_to(params["w_in"], (Dp, Kp)).astype(jnp.bfloat16)
    b_in = _pad_to(params["b_in"], (Kp,)).reshape(1, Kp).astype(jnp.float32)

    if L > 0:
        w_hid = jnp.stack(params["w_hid"])  # (L, K, K)
        b_hid = jnp.stack(params["b_hid"])  # (L, K)
    else:
        w_hid = jnp.zeros((1, K, K), jnp.float32)
        b_hid = jnp.zeros((1, K), jnp.float32)
    w_hid_p = _pad_to(w_hid, (Lh, Kp, Kp)).astype(jnp.bfloat16)
    b_hid_p = _pad_to(b_hid, (Lh, Kp)).reshape(Lh, 1, Kp).astype(jnp.float32)

    w_out = _pad_to(params["w_out"], (Kp, Op)).astype(jnp.bfloat16)
    b_out = _pad_to(params["b_out"], (Op,)).reshape(1, Op).astype(jnp.float32)

    grid = (Np // TM,)
    kernel = functools.partial(_mlp_fused_kernel, n_hidden=L)

    out_p = pl.pallas_call(
        kernel,
        out_shape=jax.ShapeDtypeStruct((Np, Op), jnp.float32),
        grid=grid,
        in_specs=[
            pl.BlockSpec((TM, Dp), lambda i: (i, 0)),        # x: tiled over batch
            pl.BlockSpec((Dp, Kp), lambda i: (0, 0)),        # w_in: VMEM-resident
            pl.BlockSpec((1, Kp), lambda i: (0, 0)),         # b_in
            pl.BlockSpec((Lh, Kp, Kp), lambda i: (0, 0, 0)),  # stacked hidden weights
            pl.BlockSpec((Lh, 1, Kp), lambda i: (0, 0, 0)),   # stacked hidden biases
            pl.BlockSpec((Kp, Op), lambda i: (0, 0)),        # w_out
            pl.BlockSpec((1, Op), lambda i: (0, 0)),         # b_out
        ],
        out_specs=pl.BlockSpec((TM, Op), lambda i: (i, 0)),
        compiler_params=pltpu.CompilerParams(
            dimension_semantics=("parallel",),
            vmem_limit_bytes=_vmem_limit_bytes(TM, Dp, Kp, Op, Lh),
        ),
    )(x_p, w_in, b_in, w_hid_p, b_hid_p, w_out, b_out)

    return out_p[:N, :O]


# ----------------------------- params / reference ---------------------------


def init_mlp_params(key, D, O, K, L, dtype=jnp.float32):
    """Deterministic init (uniform ~ PyTorch Linear default scaling).
    Weights stored as (in_features, out_features), i.e. transposed vs torch."""
    params = {}
    keys = jax.random.split(key, 2 * (L + 2))

    def _layer(kw, kb, fan_in, fan_out):
        bound = 1.0 / jnp.sqrt(jnp.asarray(fan_in, dtype))
        w = jax.random.uniform(kw, (fan_in, fan_out), dtype, -bound, bound)
        b = jax.random.uniform(kb, (fan_out,), dtype, -bound, bound)
        return w, b

    params["w_in"], params["b_in"] = _layer(keys[0], keys[1], D, K)
    params["w_hid"], params["b_hid"] = [], []
    for i in range(L):
        w, b = _layer(keys[2 + 2 * i], keys[3 + 2 * i], K, K)
        params["w_hid"].append(w)
        params["b_hid"].append(b)
    params["w_out"], params["b_out"] = _layer(keys[2 + 2 * L], keys[3 + 2 * L], K, O)
    return params


def mlp_reference(params, x, L):
    """Pure-JAX reference using the same bf16-inputs / f32-accumulate matmul contract."""

    def mm(a, w, b):
        return jnp.dot(a.astype(jnp.bfloat16), w.astype(jnp.bfloat16),
                       preferred_element_type=jnp.float32) + b

    h = jnp.maximum(mm(x, params["w_in"], params["b_in"]), 0.0)
    for i in range(L):
        h = mm(jnp.maximum(h, 0.0), params["w_hid"][i], params["b_hid"][i])
    return mm(h, params["w_out"], params["b_out"])


# ----------------------------- test ------------------------------------------


if __name__ == "__main__":
    # Small shapes consistent with the module: batch=8, D=32, K=32, O=16, L=2.
    N, D, K, O, L = 8, 32, 32, 16, 2

    key = jax.random.PRNGKey(0)
    k_params, k_x = jax.random.split(key)
    params = init_mlp_params(k_params, D, O, K, L)
    x = jax.random.normal(k_x, (N, D), jnp.float32)

    out = mlp_forward(params, x, L)
    out = jax.block_until_ready(out)

    ref = mlp_reference(params, x, L)
    assert out.shape == (N, O), out.shape
    assert jnp.allclose(out, ref, atol=2e-2, rtol=2e-2), "mismatch vs reference"

    print("KERNEL_OK")
</pallas_src>

<mosaic_0001>
module attributes {stable_mosaic.version = 11 : i64} {
  func.func @_mlp_fused_kernel(%arg0: i32, %arg1: memref<8x128xbf16, #tpu.memory_space<vmem>>, %arg2: memref<128x128xbf16, #tpu.memory_space<vmem>>, %arg3: memref<1x128xf32, #tpu.memory_space<vmem>>, %arg4: memref<2x128x128xbf16, #tpu.memory_space<vmem>>, %arg5: memref<2x1x128xf32, #tpu.memory_space<vmem>>, %arg6: memref<128x128xbf16, #tpu.memory_space<vmem>>, %arg7: memref<1x128xf32, #tpu.memory_space<vmem>>, %arg8: memref<8x128xf32, #tpu.memory_space<vmem>>) attributes {dimension_semantics = [#tpu.dimension_semantics<parallel>], iteration_bounds = array<i64: 1>, scalar_prefetch = 0 : i64, scratch_operands = 0 : i64, tpu.core_type = #tpu.core_type<tc>, window_params = [{transform_indices = @transform_0, window_bounds = array<i64: 8, 128>}, {pipeline_mode = #tpu.pipeline_mode<synchronous>, transform_indices = @transform_1, window_bounds = array<i64: 128, 128>}, {pipeline_mode = #tpu.pipeline_mode<synchronous>, transform_indices = @transform_2, window_bounds = array<i64: 1, 128>}, {pipeline_mode = #tpu.pipeline_mode<synchronous>, transform_indices = @transform_3, window_bounds = array<i64: 2, 128, 128>}, {pipeline_mode = #tpu.pipeline_mode<synchronous>, transform_indices = @transform_4, window_bounds = array<i64: 2, 1, 128>}, {pipeline_mode = #tpu.pipeline_mode<synchronous>, transform_indices = @transform_5, window_bounds = array<i64: 128, 128>}, {pipeline_mode = #tpu.pipeline_mode<synchronous>, transform_indices = @transform_6, window_bounds = array<i64: 1, 128>}, {transform_indices = @transform_7, window_bounds = array<i64: 8, 128>}]} {
    %c0 = arith.constant 0 : index
    %c0_0 = arith.constant 0 : index
    %0 = vector.load %arg1[%c0, %c0_0] : memref<8x128xbf16, #tpu.memory_space<vmem>>, vector<8x128xbf16>
    %c0_1 = arith.constant 0 : index
    %c0_2 = arith.constant 0 : index
    %1 = vector.load %arg2[%c0_1, %c0_2] : memref<128x128xbf16, #tpu.memory_space<vmem>>, vector<128x128xbf16>
    %cst = arith.constant dense<0.000000e+00> : vector<8x128xf32>
    %2 = tpu.matmul %0, %1, %cst {dimension_numbers = #tpu.dot_dimension_numbers<[1], [0], [0], [1], [0, 0, 1, 1], [], []>} : vector<8x128xbf16>, vector<128x128xbf16>, vector<8x128xf32> -> vector<8x128xf32>
    %c0_3 = arith.constant 0 : index
    %c0_4 = arith.constant 0 : index
    %3 = vector.load %arg3[%c0_3, %c0_4] : memref<1x128xf32, #tpu.memory_space<vmem>>, vector<1x128xf32>
    %4 = vector.broadcast %3 : vector<1x128xf32> to vector<8x128xf32>
    %5 = arith.addf %2, %4 : vector<8x128xf32>
    %cst_5 = arith.constant 0.000000e+00 : f32
    %6 = vector.broadcast %cst_5 : f32 to vector<8x128xf32>
    %7 = arith.maximumf %5, %6 : vector<8x128xf32>
    %cst_6 = arith.constant 0.000000e+00 : f32
    %8 = vector.broadcast %cst_6 : f32 to vector<8x128xf32>
    %9 = arith.maximumf %7, %8 : vector<8x128xf32>
    %10 = arith.truncf %9 : vector<8x128xf32> to vector<8x128xbf16>
    %c0_7 = arith.constant 0 : index
    %c0_8 = arith.constant 0 : index
    %c0_9 = arith.constant 0 : index
    %11 = vector.load %arg4[%c0_7, %c0_8, %c0_9] : memref<2x128x128xbf16, #tpu.memory_space<vmem>>, vector<1x128x128xbf16>
    %12 = vector.shape_cast %11 : vector<1x128x128xbf16> to vector<128x128xbf16>
    %cst_10 = arith.constant dense<0.000000e+00> : vector<8x128xf32>
    %13 = tpu.matmul %10, %12, %cst_10 {dimension_numbers = #tpu.dot_dimension_numbers<[1], [0], [0], [1], [0, 0, 1, 1], [], []>} : vector<8x128xbf16>, vector<128x128xbf16>, vector<8x128xf32> -> vector<8x128xf32>
    %c0_11 = arith.constant 0 : index
    %c0_12 = arith.constant 0 : index
    %c0_13 = arith.constant 0 : index
    %14 = vector.load %arg5[%c0_11, %c0_12, %c0_13] : memref<2x1x128xf32, #tpu.memory_space<vmem>>, vector<1x1x128xf32>
    %15 = vector.shape_cast %14 : vector<1x1x128xf32> to vector<1x128xf32>
    %16 = vector.broadcast %15 : vector<1x128xf32> to vector<8x128xf32>
    %17 = arith.addf %13, %16 : vector<8x128xf32>
    %cst_14 = arith.constant 0.000000e+00 : f32
    %18 = vector.broadcast %cst_14 : f32 to vector<8x128xf32>
    %19 = arith.maximumf %17, %18 : vector<8x128xf32>
    %20 = arith.truncf %19 : vector<8x128xf32> to vector<8x128xbf16>
    %c1 = arith.constant 1 : index
    %c0_15 = arith.constant 0 : index
    %c0_16 = arith.constant 0 : index
    %21 = vector.load %arg4[%c1, %c0_15, %c0_16] : memref<2x128x128xbf16, #tpu.memory_space<vmem>>, vector<1x128x128xbf16>
    %22 = vector.shape_cast %21 : vector<1x128x128xbf16> to vector<128x128xbf16>
    %cst_17 = arith.constant dense<0.000000e+00> : vector<8x128xf32>
    %23 = tpu.matmul %20, %22, %cst_17 {dimension_numbers = #tpu.dot_dimension_numbers<[1], [0], [0], [1], [0, 0, 1, 1], [], []>} : vector<8x128xbf16>, vector<128x128xbf16>, vector<8x128xf32> -> vector<8x128xf32>
    %c1_18 = arith.constant 1 : index
    %c0_19 = arith.constant 0 : index
    %c0_20 = arith.constant 0 : index
    %24 = vector.load %arg5[%c1_18, %c0_19, %c0_20] : memref<2x1x128xf32, #tpu.memory_space<vmem>>, vector<1x1x128xf32>
    %25 = vector.shape_cast %24 : vector<1x1x128xf32> to vector<1x128xf32>
    %26 = vector.broadcast %25 : vector<1x128xf32> to vector<8x128xf32>
    %27 = arith.addf %23, %26 : vector<8x128xf32>
    %28 = arith.truncf %27 : vector<8x128xf32> to vector<8x128xbf16>
    %c0_21 = arith.constant 0 : index
    %c0_22 = arith.constant 0 : index
    %29 = vector.load %arg6[%c0_21, %c0_22] : memref<128x128xbf16, #tpu.memory_space<vmem>>, vector<128x128xbf16>
    %cst_23 = arith.constant dense<0.000000e+00> : vector<8x128xf32>
    %30 = tpu.matmul %28, %29, %cst_23 {dimension_numbers = #tpu.dot_dimension_numbers<[1], [0], [0], [1], [0, 0, 1, 1], [], []>} : vector<8x128xbf16>, vector<128x128xbf16>, vector<8x128xf32> -> vector<8x128xf32>
    %c0_24 = arith.constant 0 : index
    %c0_25 = arith.constant 0 : index
    %31 = vector.load %arg7[%c0_24, %c0_25] : memref<1x128xf32, #tpu.memory_space<vmem>>, vector<1x128xf32>
    %32 = vector.broadcast %31 : vector<1x128xf32> to vector<8x128xf32>
    %33 = arith.addf %30, %32 : vector<8x128xf32>
    %c0_26 = arith.constant 0 : index
    %c0_27 = arith.constant 0 : index
    %34 = vector.load %arg8[%c0_26, %c0_27] : memref<8x128xf32, #tpu.memory_space<vmem>>, vector<8x128xf32>
    tpu.vector_store %arg8[%c0_26, %c0_27], %33 {strides = array<i32>} : memref<8x128xf32, #tpu.memory_space<vmem>>, vector<8x128xf32>,
    return
  }
  func.func @transform_0(%arg0: i32) -> (i32, i32) {
    %c0_i32 = arith.constant 0 : i32
    %c0_i32_0 = arith.constant 0 : i32
    return %arg0, %c0_i32 : i32, i32
  }
  func.func @transform_1(%arg0: i32) -> (i32, i32) {
    %c0_i32 = arith.constant 0 : i32
    %c0_i32_0 = arith.constant 0 : i32
    %c0_i32_1 = arith.constant 0 : i32
    return %c0_i32, %c0_i32_0 : i32, i32
  }
  func.func @transform_2(%arg0: i32) -> (i32, i32) {
    %c0_i32 = arith.constant 0 : i32
    %c0_i32_0 = arith.constant 0 : i32
    %c0_i32_1 = arith.constant 0 : i32
    return %c0_i32, %c0_i32_0 : i32, i32
  }
  func.func @transform_3(%arg0: i32) -> (i32, i32, i32) {
    %c0_i32 = arith.constant 0 : i32
    %c0_i32_0 = arith.constant 0 : i32
    %c0_i32_1 = arith.constant 0 : i32
    %c0_i32_2 = arith.constant 0 : i32
    return %c0_i32, %c0_i32_0, %c0_i32_1 : i32, i32, i32
  }
  func.func @transform_4(%arg0: i32) -> (i32, i32, i32) {
    %c0_i32 = arith.constant 0 : i32
    %c0_i32_0 = arith.constant 0 : i32
    %c0_i32_1 = arith.constant 0 : i32
    %c0_i32_2 = arith.constant 0 : i32
    return %c0_i32, %c0_i32_0, %c0_i32_1 : i32, i32, i32
  }
  func.func @transform_5(%arg0: i32) -> (i32, i32) {
    %c0_i32 = arith.constant 0 : i32
    %c0_i32_0 = arith.constant 0 : i32
    %c0_i32_1 = arith.constant 0 : i32
    return %c0_i32, %c0_i32_0 : i32, i32
  }
  func.func @transform_6(%arg0: i32) -> (i32, i32) {
    %c0_i32 = arith.constant 0 : i32
    %c0_i32_0 = arith.constant 0 : i32
    %c0_i32_1 = arith.constant 0 : i32
    return %c0_i32, %c0_i32_0 : i32, i32
  }
  func.func @transform_7(%arg0: i32) -> (i32, i32) {
    %c0_i32 = arith.constant 0 : i32
    %c0_i32_0 = arith.constant 0 : i32
    return %arg0, %c0_i32 : i32, i32
  }
}

</mosaic_0001>

<bundles_post_ra>
// kernel: tpu_custom_call.1
= control target key start
LH: loop header
LB: loop body
LE: loop exit
PB: predicated region body
PF: predicated region fallthrough
CT: control target
= control target key end

     0   :  { %12 = vsyncpa [#allocation3], 0  ;;  %s1034_s0 = inlined_call_operand.hbm [shape: bf16[8,128], index: 0, kind: input, shape index: {}]   ;;  %s1035_s1 = inlined_call_operand.hbm [shape: bf16[128,128], index: 1, kind: input, shape index: {}]   ;;  %s1036_s2 = inlined_call_operand.vmem [shape: f32[1,128], index: 2, kind: input, shape index: {}]   ;;  %s1037_s3 = inlined_call_operand.hbm [shape: bf16[2,128,128], index: 3, kind: input, shape index: {}]   ;;  %s1038_s4 = inlined_call_operand.vmem [shape: f32[2,1,128], index: 4, kind: input, shape index: {}]   ;;  %s1039_s5 = inlined_call_operand.hbm [shape: bf16[128,128], index: 5, kind: input, shape index: {}]   ;;  %s1040_s6 = inlined_call_operand.vmem [shape: f32[1,128], index: 6, kind: input, shape index: {}]   ;;  %s1041_s7 = inlined_call_operand.hbm [shape: f32[8,128], index: 7, kind: output, shape index: {}]  }
   0x1   :  { %13 = vsyncpa [#allocation6], 0 }
   0x2   :  { %14 = vsyncpa [#allocation9], 0 }
   0x3   :  { %15 = vsyncpa [#allocation4], 0  ;;  %s864_s24 = smov [#allocation5]   ;;  %s746_s28 = scalar_lea.hbm %s1035_s1, 1024 }
   0x4   :  { %s31_s25 = sshll.u32 %s864_s24, 4  ;;  %p747_p0 = scmp.ne.s32.totalorder %s1035_s1, %s746_s28  ;;  %s32_s25 = int_to_ptr.vmem [resolvable:$true] %s31_s25 }
   0x5   :  { %p750_p1 = scmp.lt.u32.totalorder %s746_s28, %s1035_s1 }
   0x7   :  { %p752_p2 = pnand %p750_p1, %p747_p0 }
   0x9   :  { %755 = shalt.err (!%p752_p2)
}
   0xa   :  { %s756_s10 = scalar_lea.vmem %s32_s25, 1024  ;;  %p761_p4 = scmp.lt.s32.totalorder %s32_s25, %s32_s25 }
   0xb   :  { %p757_p3 = scmp.ne.s32.totalorder %s32_s25, %s756_s10  ;;  %p762_p5 = scmp.lt.s32.totalorder %s756_s10, %s756_s10 }
   0xd   :  { %p763_p6 = por %p762_p5, %p761_p4 }
   0xf   :  { %p764_p7 = pnand %p763_p6, %p757_p3 }
  0x11   :  { %767 = shalt.err (!%p764_p7)
}
  0x12   :  { %s865_s11 = smov 64   ;;  %s866_s12 = smov 4  }
  0x13   :  { %37 = dma.hbm_to_vmem [thread:$0]  %s1035_s1, 1024, %s32_s25, [#allocation6], %s865_s11, %s865_s11, %s866_s12  }
  0x14   :  { %s867_s15 = smov [#allocation2]   ;;  %s868_s17 = smov [#allocation7]  }
  0x15   :  { %s22_s16 = sshll.u32 %s867_s15, 4  ;;  %s45_s18 = sshll.u32 %s868_s17, 4  ;;  %s23_s16 = int_to_ptr.vmem [resolvable:$true] %s22_s16  ;;  %s46_s18 = int_to_ptr.vmem [resolvable:$true] %s45_s18 }
  0x16   :  { %s768_s21 = scalar_lea.hbm %s1034_s0, 64 }
  0x17   :  { %p769_p8 = scmp.ne.s32.totalorder %s1034_s0, %s768_s21  ;;  %p772_p9 = scmp.lt.u32.totalorder %s768_s21, %s1034_s0 }
  0x19   :  { %p774_p10 = pnand %p772_p9, %p769_p8 }
  0x1b   :  { %777 = shalt.err (!%p774_p10)
}
  0x1c   :  { %s778_s1 = scalar_lea.vmem %s23_s16, 64  ;;  %p783_p12 = scmp.lt.s32.totalorder %s23_s16, %s23_s16 }
  0x1d   :  { %p779_p11 = scmp.ne.s32.totalorder %s23_s16, %s778_s1  ;;  %p784_p13 = scmp.lt.s32.totalorder %s778_s1, %s778_s1 }
  0x1f   :  { %p785_p0 = por %p784_p13, %p783_p12 }
  0x21   :  { %p786_p1 = pnand %p785_p0, %p779_p11 }
  0x23   :  { %789 = shalt.err (!%p786_p1)
}
  0x24   :  { %25 = dma.hbm_to_vmem [thread:$0]  %s1034_s0, 64, %s23_s16, [#allocation3]  }
  0x25   :  { %s790_s30 = scalar_lea.hbm %s1037_s3, 2048 }
  0x26   :  { %p791_p2 = scmp.ne.s32.totalorder %s1037_s3, %s790_s30  ;;  %p794_p3 = scmp.lt.u32.totalorder %s790_s30, %s1037_s3 }
  0x28   :  { %p796_p4 = pnand %p794_p3, %p791_p2 }
  0x2a   :  { %799 = shalt.err (!%p796_p4)
}
  0x2b   :  { %s800_s14 = scalar_lea.vmem %s46_s18, 2048  ;;  %p805_p6 = scmp.lt.s32.totalorder %s46_s18, %s46_s18 }
  0x2c   :  { %p801_p5 = scmp.ne.s32.totalorder %s46_s18, %s800_s14  ;;  %p806_p7 = scmp.lt.s32.totalorder %s800_s14, %s800_s14 }
  0x2e   :  { %p807_p8 = por %p806_p7, %p805_p6 }
  0x30   :  { %p808_p9 = pnand %p807_p8, %p801_p5 }
  0x32   :  { %811 = shalt.err (!%p808_p9)
}
  0x33   :  { %51 = dma.hbm_to_vmem [thread:$0]  %s1037_s3, 2048, %s46_s18, [#allocation6], %s865_s11, %s865_s11, %s866_s12  }
  0x34   :  { %s869_s16 = smov [#allocation8]   ;;  %s812_s21 = scalar_lea.hbm %s1039_s5, 1024 }
  0x35   :  { %s59_s17 = sshll.u32 %s869_s16, 4  ;;  %p813_p10 = scmp.ne.s32.totalorder %s1039_s5, %s812_s21  ;;  %s60_s17 = int_to_ptr.vmem [resolvable:$true] %s59_s17 }
  0x36   :  { %p816_p11 = scmp.lt.u32.totalorder %s812_s21, %s1039_s5 }
  0x38   :  { %p818_p12 = pnand %p816_p11, %p813_p10 }
  0x3a   :  { %821 = shalt.err (!%p818_p12)
}
  0x3b   :  { %s822_s1 = scalar_lea.vmem %s60_s17, 1024  ;;  %p827_p0 = scmp.lt.s32.totalorder %s60_s17, %s60_s17 }
  0x3c   :  { %p823_p13 = scmp.ne.s32.totalorder %s60_s17, %s822_s1  ;;  %p828_p1 = scmp.lt.s32.totalorder %s822_s1, %s822_s1 }
  0x3e   :  { %p829_p2 = por %p828_p1, %p827_p0 }
  0x40   :  { %p830_p3 = pnand %p829_p2, %p823_p13 }
  0x42   :  { %833 = shalt.err (!%p830_p3)
}
  0x43   :  { %65 = dma.hbm_to_vmem [thread:$0]  %s1039_s5, 1024, %s60_s17, [#allocation9], %s865_s11, %s865_s11, %s866_s12  }
  0x44   :  { %856 = dma.done.wait [#allocation3], 64  }
  0x45   :  { %857 = vsyncadd [#allocation3], 4294967232 }
  0x46   :  { %858 = dma.done.wait [#allocation6], 3072  }
  0x47   :  { %859 = vsyncadd [#allocation6], 4294964224 }
  0x48   :  { %860 = dma.done.wait [#allocation9], 1024  }
  0x49   :  { %861 = vsyncadd [#allocation9], 4294966272  ;;  %v870_v0 = vmov 0.0   ;;  %vm871_vm0 = vmmov 0   ;;  %v714_v1 = vld [vmem:[#allocation5] sm:$0xff]   ;;  %v715_v2 = vld [vmem:[#allocation5 + $0x8] sm:$0xff]  }
  0x4a   :  { %625 = vmatprep.subr.bf16.mxu0 %v870_v0  ;;  %641 = vmatprep.mubr.msk.bf16.mxu0 %vm871_vm0, %v870_v0  ;;  %v716_v3 = vld [vmem:[#allocation5 + $0x10] sm:$0xff]   ;;  %v722_v4 = vld [vmem:[#allocation7] sm:$0xff]   ;;  %v717_v5 = vld [vmem:[#allocation5 + $0x18] sm:$0xff]   ;;  %s872_s30 = smov [#allocation10]  }
  0x4b   :  { %645 = vmatprep.subr.bf16.mxu1 %v870_v0  ;;  %661 = vmatprep.mubr.msk.bf16.mxu1 %vm871_vm0, %v870_v0  ;;  %v723_v6 = vld [vmem:[#allocation7 + $0x8] sm:$0xff]   ;;  %v718_v7 = vld [vmem:[#allocation5 + $0x20] sm:$0xff]   ;;  %v724_v8 = vld [vmem:[#allocation7 + $0x10] sm:$0xff]   ;;  %s541_s8 = sshll.u32 %s872_s30, 4  ;;  %s542_s8 = int_to_ptr.vmem [resolvable:$true] %s541_s8 }
  0x4c   :  { %626 = vmatpush3.bf16.msra.mxu0 %v714_v1  ;;  %646 = vmatpush3.bf16.msra.mxu1 %v722_v4  ;;  %v719_v9 = vld [vmem:[#allocation5 + $0x28] sm:$0xff]   ;;  %v725_v10 = vld [vmem:[#allocation7 + $0x18] sm:$0xff]   ;;  %v720_v11 = vld [vmem:[#allocation5 + $0x30] sm:$0xff]   ;;  %p839_p5 = scmp.lt.s32.totalorder %s542_s8, %s542_s8 }
  0x4d   :  { %627 = vmatprep.subr.bf16.mxu0 %v870_v0  ;;  %647 = vmatprep.subr.bf16.mxu1 %v870_v0  ;;  %v726_v12 = vld [vmem:[#allocation7 + $0x20] sm:$0xff]   ;;  %v721_v13 = vld [vmem:[#allocation5 + $0x38] sm:$0xff]   ;;  %v727_v14 = vld [vmem:[#allocation7 + $0x28] sm:$0xff]  }
  0x4e   :  { %v81_v15 = vld [vmem:[#allocation2] sm:$0xf]  ;;  %v728_v16 = vld [vmem:[#allocation7 + $0x30] sm:$0xff]   ;;  %v730_v18 = vld [vmem:[#allocation7 + $0x40] sm:$0xff]  }
  0x4f   :  { %v729_v17 = vld [vmem:[#allocation7 + $0x38] sm:$0xff]   ;;  %v731_v19 = vld [vmem:[#allocation7 + $0x48] sm:$0xff]   ;;  %v732_v20 = vld [vmem:[#allocation7 + $0x50] sm:$0xff]  }
  0x50   :  { %628 = vmatpush3.bf16.msra.mxu0 %v715_v2  ;;  %648 = vmatpush3.bf16.msra.mxu1 %v723_v6  ;;  %v733_v21 = vld [vmem:[#allocation7 + $0x58] sm:$0xff]   ;;  %v734_v22 = vld [vmem:[#allocation7 + $0x60] sm:$0xff]   ;;  %v735_v23 = vld [vmem:[#allocation7 + $0x68] sm:$0xff]  }
  0x51   :  { %629 = vmatprep.subr.bf16.mxu0 %v870_v0  ;;  %649 = vmatprep.subr.bf16.mxu1 %v870_v0  ;;  %v552_v24 = vld [vmem:[%s1036_s2] ss:$0 sm:$0xff]  ;;  %v736_v33 = vld [vmem:[#allocation7 + $0x70] sm:$0xff]   ;;  %v738_v35 = vld [vmem:[#allocation8] sm:$0xff]  }
  0x52   :  { %v737_v34 = vld [vmem:[#allocation7 + $0x78] sm:$0xff]   ;;  %v739_v36 = vld [vmem:[#allocation8 + $0x8] sm:$0xff]   ;;  %v740_v37 = vld [vmem:[#allocation8 + $0x10] sm:$0xff]  }
  0x53   :  { %v741_v38 = vld [vmem:[#allocation8 + $0x18] sm:$0xff]   ;;  %v742_v39 = vld [vmem:[#allocation8 + $0x20] sm:$0xff]   ;;  %v743_v40 = vld [vmem:[#allocation8 + $0x28] sm:$0xff]  }
  0x54   :  { %630 = vmatpush3.bf16.msra.mxu0 %v716_v3  ;;  %650 = vmatpush3.bf16.msra.mxu1 %v724_v8  ;;  %v744_v41 = vld [vmem:[#allocation8 + $0x30] sm:$0xff]   ;;  %v561_v42 = vld [vmem:[%s1038_s4] ss:$0 sm:$0xff]  ;;  %v571_v51 = vld [vmem:[%s1038_s4 + $0x1] ss:$0 sm:$0xff]  ;;  %s834_s4 = scalar_lea.vmem %s542_s8, 128 }
  0x55   :  { %631 = vmatprep.subr.bf16.mxu0 %v870_v0  ;;  %651 = vmatprep.subr.bf16.mxu1 %v870_v0  ;;  %v745_v50 = vld [vmem:[#allocation8 + $0x38] sm:$0xff]   ;;  %p835_p4 = scmp.ne.s32.totalorder %s542_s8, %s834_s4  ;;  %p840_p6 = scmp.lt.s32.totalorder %s834_s4, %s834_s4 }
  0x56   :  { %v580_v58 = vld [vmem:[%s1040_s6] ss:$0 sm:$0xff] }
  0x57   :  { %p841_p7 = por %p840_p6, %p839_p5 }
  0x58   :  { %632 = vmatpush3.bf16.msra.mxu0 %v717_v5  ;;  %652 = vmatpush3.bf16.msra.mxu1 %v725_v10 }
  0x59   :  { %633 = vmatprep.subr.bf16.mxu0 %v870_v0  ;;  %653 = vmatprep.subr.bf16.mxu1 %v870_v0  ;;  %p842_p8 = pnand %p841_p7, %p835_p4 }
  0x5c   :  { %634 = vmatpush3.bf16.msra.mxu0 %v718_v7  ;;  %654 = vmatpush3.bf16.msra.mxu1 %v726_v12 }
  0x5d   :  { %635 = vmatprep.subr.bf16.mxu0 %v870_v0  ;;  %655 = vmatprep.subr.bf16.mxu1 %v870_v0 }
  0x60   :  { %636 = vmatpush3.bf16.msra.mxu0 %v719_v9  ;;  %656 = vmatpush3.bf16.msra.mxu1 %v727_v14 }
  0x61   :  { %637 = vmatprep.subr.bf16.mxu0 %v870_v0  ;;  %657 = vmatprep.subr.bf16.mxu1 %v870_v0 }
  0x64   :  { %638 = vmatpush3.bf16.msra.mxu0 %v720_v11  ;;  %658 = vmatpush3.bf16.msra.mxu1 %v728_v16 }
  0x65   :  { %639 = vmatprep.subr.bf16.mxu0 %v870_v0  ;;  %659 = vmatprep.subr.bf16.mxu1 %v870_v0 }
  0x68   :  { %640 = vmatpush3.bf16.msra.mxu0 %v721_v13  ;;  %660 = vmatpush3.bf16.msra.mxu1 %v729_v17 }
  0x69   :  { %665 = vmatprep.subr.bf16.mxu0 %v870_v0  ;;  %685 = vmatprep.subr.bf16.mxu1 %v870_v0 }
  0x6b   :  { %642 = vmatmul.mubr.bf16.vlgmr.msra.gmra.mrb[0].mxu0 %v81_v15 }
  0x6c   :  { %681 = vmatprep.mubr.msk.bf16.mxu0 %vm871_vm0, %v870_v0  ;;  %666 = vmatpush3.bf16.msra.mxu0 %v730_v18 }
  0x6d   :  { %667 = vmatprep.subr.bf16.mxu0 %v870_v0 }
  0x70   :  { %668 = vmatpush3.bf16.msra.mxu0 %v731_v19 }
  0x71   :  { %669 = vmatprep.subr.bf16.mxu0 %v870_v0 }
  0x74   :  { %670 = vmatpush3.bf16.msra.mxu0 %v732_v20 }
  0x75   :  { %671 = vmatprep.subr.bf16.mxu0 %v870_v0 }
  0x78   :  { %672 = vmatpush3.bf16.msra.mxu0 %v733_v21 }
  0x79   :  { %673 = vmatprep.subr.bf16.mxu0 %v870_v0 }
  0x7c   :  { %674 = vmatpush3.bf16.msra.mxu0 %v734_v22 }
  0x7d   :  { %675 = vmatprep.subr.bf16.mxu0 %v870_v0 }
  0x80   :  { %676 = vmatpush3.bf16.msra.mxu0 %v735_v23 }
  0x81   :  { %677 = vmatprep.subr.bf16.mxu0 %v870_v0 }
  0x84   :  { %678 = vmatpush3.bf16.msra.mxu0 %v736_v33 }
  0x85   :  { %679 = vmatprep.subr.bf16.mxu0 %v870_v0 }
  0x88   :  { %680 = vmatpush3.bf16.msra.mxu0 %v737_v34 }
 0x13e   :  { %v187_v25 = vpop.f32.mrb[0].mxu0 }
 0x13f   :  { %v188_v26 = vadd.f32 %v552_v24, %v187_v25  ;;  %v643_v27 = vpop.f32.mrb[1].mxu0 }
 0x140   :  { %v190_v28 = vpop.f32.mrb[2].mxu0 }
 0x141   :  { %v193_v29 = vmax.f32 %v188_v26, 0.0  ;;  %v644_v30 = vpop.f32.mrb[3].mxu0 }
 0x143   :  { %v194_v31 = vmax.f32 %v193_v29, 0.0 }
 0x145   :  { %v195_v32 = vpack.c.bf16 %v194_v31, %v194_v31 }
 0x147   :  { %662 = vmatmul.mubr.bf16.vlgmr.msra.gmra.mrb[0].mxu1 %v195_v32 }
 0x148   :  { %701 = vmatprep.mubr.msk.bf16.mxu1 %vm871_vm0, %v870_v0  ;;  %686 = vmatpush3.bf16.msra.mxu1 %v738_v35 }
 0x149   :  { %687 = vmatprep.subr.bf16.mxu1 %v870_v0 }
 0x14c   :  { %688 = vmatpush3.bf16.msra.mxu1 %v739_v36 }
 0x14d   :  { %689 = vmatprep.subr.bf16.mxu1 %v870_v0 }
 0x150   :  { %690 = vmatpush3.bf16.msra.mxu1 %v740_v37 }
 0x151   :  { %691 = vmatprep.subr.bf16.mxu1 %v870_v0 }
 0x154   :  { %692 = vmatpush3.bf16.msra.mxu1 %v741_v38 }
 0x155   :  { %693 = vmatprep.subr.bf16.mxu1 %v870_v0 }
 0x158   :  { %694 = vmatpush3.bf16.msra.mxu1 %v742_v39 }
 0x159   :  { %695 = vmatprep.subr.bf16.mxu1 %v870_v0 }
 0x15c   :  { %696 = vmatpush3.bf16.msra.mxu1 %v743_v40 }
 0x15d   :  { %697 = vmatprep.subr.bf16.mxu1 %v870_v0 }
 0x160   :  { %698 = vmatpush3.bf16.msra.mxu1 %v744_v41 }
 0x161   :  { %699 = vmatprep.subr.bf16.mxu1 %v870_v0 }
 0x164   :  { %700 = vmatpush3.bf16.msra.mxu1 %v745_v50 }
 0x21a   :  { %v301_v43 = vpop.f32.mrb[0].mxu1 }
 0x21b   :  { %v302_v44 = vadd.f32 %v561_v42, %v301_v43  ;;  %v663_v45 = vpop.f32.mrb[1].mxu1 }
 0x21c   :  { %v304_v46 = vpop.f32.mrb[2].mxu1 }
 0x21d   :  { %v307_v47 = vmax.f32 %v302_v44, 0.0  ;;  %v664_v48 = vpop.f32.mrb[3].mxu1 }
 0x21f   :  { %v308_v49 = vpack.c.bf16 %v307_v47, %v307_v47 }
 0x221   :  { %682 = vmatmul.mubr.bf16.vlgmr.msra.gmra.mrb[4].mxu0 %v308_v49 }
 0x2f4   :  { %v416_v52 = vpop.f32.mrb[4].mxu0 }
 0x2f5   :  { %v417_v53 = vadd.f32 %v571_v51, %v416_v52  ;;  %v683_v54 = vpop.f32.mrb[5].mxu0 }
 0x2f6   :  { %v419_v55 = vpop.f32.mrb[6].mxu0 }
 0x2f7   :  { %v422_v56 = vpack.c.bf16 %v417_v53, %v417_v53  ;;  %v684_v57 = vpop.f32.mrb[7].mxu0 }
 0x2f9   :  { %702 = vmatmul.mubr.bf16.vlgmr.msra.gmra.mrb[4].mxu1 %v422_v56 }
 0x3cc   :  { %v528_v59 = vpop.f32.mrb[4].mxu1 }
 0x3cd   :  { %v529_v60 = vadd.f32 %v580_v58, %v528_v59  ;;  %v703_v61 = vpop.f32.mrb[5].mxu1 }
 0x3ce   :  { %v531_v62 = vpop.f32.mrb[6].mxu1 }
 0x3cf   :  { %534 = vst [vmem:[#allocation10] sm:$0xff] %v529_v60  ;;  %v704_v63 = vpop.f32.mrb[7].mxu1 }
 0x3d0   :  { %845 = shalt.err (!%p842_p8)
}
 0x3d1   :  { %s846_s6 = scalar_lea.hbm %s1041_s7, 128 }
 0x3d2   :  { %p847_p9 = scmp.ne.s32.totalorder %s1041_s7, %s846_s6  ;;  %p850_p10 = scmp.lt.u32.totalorder %s846_s6, %s1041_s7 }
 0x3d4   :  { %p852_p11 = pnand %p850_p10, %p847_p9 }
 0x3d6   :  { %855 = shalt.err (!%p852_p11)
}
 0x3d7   :  { %544 = dma.vmem_to_hbm [thread:$0]  %s542_s8, 128, %s1041_s7, [#allocation4]  }
 0x3d8   :  { %862 = dma.done.wait [#allocation4], 128  }
 0x3d9   :  { %863 = vsyncadd [#allocation4], 4294967168 }
 0x3da   :  { %548 = vsyncpa [#allocation3], 1 }
 0x3db   :  { %549 = vsyncpa [#allocation6], 1 }
 0x3dc   :  { %550 = vsyncpa [#allocation9], 1 }
 0x3dd   :  { %551 = vsyncpa [#allocation4], 1 }

</bundles_post_ra>
